<compile_context>
chip_gen: v7x
topology: tpu7x:2x2x1
jax: 0.10.0
libtpu: 0.0.40
codegen_flags: <defaults>
</compile_context>

<pallas_src>
import jax
import jax.numpy as jnp
import numpy as np
from jax.experimental import pallas as pl
from jax.experimental.pallas import tpu as pltpu

_HIGHEST = jax.lax.Precision.HIGHEST


def _round_up(x, m):
    return ((x + m - 1) // m) * m


def _mlp_critic_kernel(x_ref, w1_ref, b1_ref, w2_ref, b2_ref, w3_ref, b3_ref,
                       o_ref):
    # x_ref : [obs_dim, TB]   (batch on lanes)
    # w1_ref: [H1, obs_dim]   b1_ref: [H1, 1]
    # w2_ref: [H2, H1]        b2_ref: [H2, 1]
    # w3_ref: [1, H2]         b3_ref: [1, 1]  (SMEM scalar)
    # o_ref : [1, TB]
    x = x_ref[...]

    # Layer 1: Linear + Tanh
    h = jnp.dot(w1_ref[...], x, preferred_element_type=jnp.float32,
                precision=_HIGHEST) + b1_ref[...]
    h = jnp.tanh(h)

    # Layer 2: Linear + Tanh
    h = jnp.dot(w2_ref[...], h, preferred_element_type=jnp.float32,
                precision=_HIGHEST) + b2_ref[...]
    h = jnp.tanh(h)

    # Output layer: Linear (Identity activation), out_features = 1
    o_ref[...] = (jnp.dot(w3_ref[...], h, preferred_element_type=jnp.float32,
                          precision=_HIGHEST)
                  + b3_ref[0, 0]).astype(o_ref.dtype)


def mlp_critic_forward(obs, params, *, tile_b=None):
    """obs: [B, obs_dim] float32.  params: (W1,b1,W2,b2,W3,b3) with W_k of
    shape [out, in] (PyTorch layout) and b_k of shape [out, 1].
    Returns value estimates of shape [B]."""
    w1, b1, w2, b2, w3, b3 = params
    B, obs_dim = obs.shape
    H1 = w1.shape[0]
    H2 = w2.shape[0]

    # Batch tile: batch is on the lane axis -> multiple of 128.
    if tile_b is None:
        tile_b = min(512, _round_up(B, 128))
    B_pad = _round_up(B, tile_b)

    # Batch on lanes: [obs_dim, B], zero-padded to the tile boundary.
    obs_t = obs.T
    if B_pad != B:
        obs_t = jnp.pad(obs_t, ((0, 0), (0, B_pad - B)))

    grid = (B_pad // tile_b,)

    flops = 2 * B_pad * (obs_dim * H1 + H1 * H2 + H2 * 1)
    transcendentals = B_pad * (H1 + H2)
    bytes_accessed = 4 * (int(obs_t.size)
                          + sum(int(p.size) for p in params)
                          + B_pad)

    out = pl.pallas_call(
        _mlp_critic_kernel,
        out_shape=jax.ShapeDtypeStruct((1, B_pad), jnp.float32),
        grid=grid,
        in_specs=[
            # obs tile: new batch slab each grid step.
            pl.BlockSpec((obs_dim, tile_b), lambda i: (0, i)),
            # Weights / biases: constant block index -> stay VMEM-resident.
            pl.BlockSpec((H1, obs_dim), lambda i: (0, 0)),
            pl.BlockSpec((H1, 1), lambda i: (0, 0)),
            pl.BlockSpec((H2, H1), lambda i: (0, 0)),
            pl.BlockSpec((H2, 1), lambda i: (0, 0)),
            pl.BlockSpec((1, H2), lambda i: (0, 0)),
            # b3 is a single scalar -> SMEM, no VMEM tile / DMA per step.
            pl.BlockSpec(memory_space=pltpu.MemorySpace.SMEM),
        ],
        out_specs=pl.BlockSpec((1, tile_b), lambda i: (0, i)),
        compiler_params=pltpu.CompilerParams(
            dimension_semantics=("parallel",)),
        cost_estimate=pl.CostEstimate(
            flops=flops,
            transcendentals=transcendentals,
            bytes_accessed=bytes_accessed),
    )(obs_t, w1, b1, w2, b2, w3, b3)

    # torch.squeeze(v_net(obs), -1)  -> drop padding, shape [B]
    return out[0, :B]


def init_params(key, obs_dim, hidden_sizes):
    """Deterministic init mimicking nn.Linear default (U[-1/sqrt(fan_in), +]).
    Weights stored as [out, in] (PyTorch layout), biases as [out, 1]."""
    sizes = [obs_dim] + list(hidden_sizes) + [1]
    params = []
    for j in range(len(sizes) - 1):
        fan_in, fan_out = sizes[j], sizes[j + 1]
        key, kw, kb = jax.random.split(key, 3)
        bound = 1.0 / float(np.sqrt(fan_in))
        w = jax.random.uniform(kw, (fan_out, fan_in), jnp.float32,
                               -bound, bound)
        b = jax.random.uniform(kb, (fan_out, 1), jnp.float32, -bound, bound)
        params += [w, b]
    return tuple(params)


def reference_forward(obs, params):
    w1, b1, w2, b2, w3, b3 = params
    h = jnp.tanh(jnp.dot(obs, w1.T, precision=_HIGHEST) + b1.T)
    h = jnp.tanh(jnp.dot(h, w2.T, precision=_HIGHEST) + b2.T)
    return jnp.squeeze(jnp.dot(h, w3.T, precision=_HIGHEST) + b3.T, axis=-1)


if __name__ == "__main__":
    B, obs_dim = 8, 16
    hidden_sizes = (32, 32)

    key = jax.random.PRNGKey(0)
    key, kobs = jax.random.split(key)
    obs = jax.random.normal(kobs, (B, obs_dim), jnp.float32)
    params = init_params(key, obs_dim, hidden_sizes)

    v = mlp_critic_forward(obs, params)
    v = jax.block_until_ready(v)

    v_ref = reference_forward(obs, params)
    assert v.shape == (B,)
    assert jnp.allclose(v, v_ref, atol=1e-5, rtol=1e-5)

    # Second check: non-multiple-of-tile batch exercises padding + multi-step grid.
    key, kobs2 = jax.random.split(key)
    obs2 = jax.random.normal(kobs2, (200, obs_dim), jnp.float32)
    v2 = jax.block_until_ready(mlp_critic_forward(obs2, params, tile_b=128))
    v2_ref = reference_forward(obs2, params)
    assert v2.shape == (200,)
    assert jnp.allclose(v2, v2_ref, atol=1e-5, rtol=1e-5)

    print("KERNEL_OK")
</pallas_src>

<mosaic_0001>
module attributes {stable_mosaic.version = 11 : i64} {
  func.func @_mlp_critic_kernel(%arg0: i32, %arg1: memref<16x128xf32, #tpu.memory_space<vmem>>, %arg2: memref<32x16xf32, #tpu.memory_space<vmem>>, %arg3: memref<32x1xf32, #tpu.memory_space<vmem>>, %arg4: memref<32x32xf32, #tpu.memory_space<vmem>>, %arg5: memref<32x1xf32, #tpu.memory_space<vmem>>, %arg6: memref<1x32xf32, #tpu.memory_space<vmem>>, %arg7: memref<1x1xf32, #tpu.memory_space<smem>>, %arg8: memref<1x128xf32, #tpu.memory_space<vmem>>) attributes {dimension_semantics = [#tpu.dimension_semantics<parallel>], iteration_bounds = array<i64: 1>, scalar_prefetch = 0 : i64, scratch_operands = 0 : i64, tpu.core_type = #tpu.core_type<tc>, window_params = [{transform_indices = @transform_0, window_bounds = array<i64: 16, 128>}, {pipeline_mode = #tpu.pipeline_mode<synchronous>, transform_indices = @transform_1, window_bounds = array<i64: 32, 16>}, {pipeline_mode = #tpu.pipeline_mode<synchronous>, transform_indices = @transform_2, window_bounds = array<i64: 32, 1>}, {pipeline_mode = #tpu.pipeline_mode<synchronous>, transform_indices = @transform_3, window_bounds = array<i64: 32, 32>}, {pipeline_mode = #tpu.pipeline_mode<synchronous>, transform_indices = @transform_4, window_bounds = array<i64: 32, 1>}, {pipeline_mode = #tpu.pipeline_mode<synchronous>, transform_indices = @transform_5, window_bounds = array<i64: 1, 32>}, {transform_indices = @transform_6, window_bounds = array<i64: 1, 1>}, {transform_indices = @transform_7, window_bounds = array<i64: 1, 128>}]} {
    %c0 = arith.constant 0 : index
    %c0_0 = arith.constant 0 : index
    %0 = vector.load %arg1[%c0, %c0_0] : memref<16x128xf32, #tpu.memory_space<vmem>>, vector<16x128xf32>
    %c0_1 = arith.constant 0 : index
    %c0_2 = arith.constant 0 : index
    %1 = vector.load %arg2[%c0_1, %c0_2] : memref<32x16xf32, #tpu.memory_space<vmem>>, vector<32x16xf32>
    %cst = arith.constant dense<0.000000e+00> : vector<32x128xf32>
    %2 = tpu.matmul %1, %0, %cst {dimension_numbers = #tpu.dot_dimension_numbers<[1], [0], [0], [1], [0, 0, 1, 1], [], []>, precision = #tpu.contract_precision<fp32>} : vector<32x16xf32>, vector<16x128xf32>, vector<32x128xf32> -> vector<32x128xf32>
    %c0_3 = arith.constant 0 : index
    %c0_4 = arith.constant 0 : index
    %3 = vector.load %arg3[%c0_3, %c0_4] : memref<32x1xf32, #tpu.memory_space<vmem>>, vector<32x1xf32>
    %4 = vector.broadcast %3 : vector<32x1xf32> to vector<32x128xf32>
    %5 = arith.addf %2, %4 : vector<32x128xf32>
    %6 = math.tanh %5 : vector<32x128xf32>
    %c0_5 = arith.constant 0 : index
    %c0_6 = arith.constant 0 : index
    %7 = vector.load %arg4[%c0_5, %c0_6] : memref<32x32xf32, #tpu.memory_space<vmem>>, vector<32x32xf32>
    %cst_7 = arith.constant dense<0.000000e+00> : vector<32x128xf32>
    %8 = tpu.matmul %7, %6, %cst_7 {dimension_numbers = #tpu.dot_dimension_numbers<[1], [0], [0], [1], [0, 0, 1, 1], [], []>, precision = #tpu.contract_precision<fp32>} : vector<32x32xf32>, vector<32x128xf32>, vector<32x128xf32> -> vector<32x128xf32>
    %c0_8 = arith.constant 0 : index
    %c0_9 = arith.constant 0 : index
    %9 = vector.load %arg5[%c0_8, %c0_9] : memref<32x1xf32, #tpu.memory_space<vmem>>, vector<32x1xf32>
    %10 = vector.broadcast %9 : vector<32x1xf32> to vector<32x128xf32>
    %11 = arith.addf %8, %10 : vector<32x128xf32>
    %12 = math.tanh %11 : vector<32x128xf32>
    %c0_10 = arith.constant 0 : index
    %c0_11 = arith.constant 0 : index
    %13 = vector.load %arg6[%c0_10, %c0_11] : memref<1x32xf32, #tpu.memory_space<vmem>>, vector<1x32xf32>
    %cst_12 = arith.constant dense<0.000000e+00> : vector<1x128xf32>
    %14 = tpu.matmul %13, %12, %cst_12 {dimension_numbers = #tpu.dot_dimension_numbers<[1], [0], [0], [1], [0, 0, 1, 1], [], []>, precision = #tpu.contract_precision<fp32>} : vector<1x32xf32>, vector<32x128xf32>, vector<1x128xf32> -> vector<1x128xf32>
    %c0_13 = arith.constant 0 : index
    %c0_14 = arith.constant 0 : index
    %15 = memref.load %arg7[%c0_13, %c0_14] : memref<1x1xf32, #tpu.memory_space<smem>>
    %16 = vector.broadcast %15 : f32 to vector<1x128xf32>
    %17 = arith.addf %14, %16 : vector<1x128xf32>
    %c0_15 = arith.constant 0 : index
    %c0_16 = arith.constant 0 : index
    %18 = vector.load %arg8[%c0_15, %c0_16] : memref<1x128xf32, #tpu.memory_space<vmem>>, vector<1x128xf32>
    tpu.vector_store %arg8[%c0_15, %c0_16], %17 {strides = array<i32>} : memref<1x128xf32, #tpu.memory_space<vmem>>, vector<1x128xf32>,
    return
  }
  func.func @transform_0(%arg0: i32) -> (i32, i32) {
    %c0_i32 = arith.constant 0 : i32
    %c0_i32_0 = arith.constant 0 : i32
    return %c0_i32, %arg0 : i32, i32
  }
  func.func @transform_1(%arg0: i32) -> (i32, i32) {
    %c0_i32 = arith.constant 0 : i32
    %c0_i32_0 = arith.constant 0 : i32
    %c0_i32_1 = arith.constant 0 : i32
    return %c0_i32, %c0_i32_0 : i32, i32
  }
  func.func @transform_2(%arg0: i32) -> (i32, i32) {
    %c0_i32 = arith.constant 0 : i32
    %c0_i32_0 = arith.constant 0 : i32
    %c0_i32_1 = arith.constant 0 : i32
    return %c0_i32, %c0_i32_0 : i32, i32
  }
  func.func @transform_3(%arg0: i32) -> (i32, i32) {
    %c0_i32 = arith.constant 0 : i32
    %c0_i32_0 = arith.constant 0 : i32
    %c0_i32_1 = arith.constant 0 : i32
    return %c0_i32, %c0_i32_0 : i32, i32
  }
  func.func @transform_4(%arg0: i32) -> (i32, i32) {
    %c0_i32 = arith.constant 0 : i32
    %c0_i32_0 = arith.constant 0 : i32
    %c0_i32_1 = arith.constant 0 : i32
    return %c0_i32, %c0_i32_0 : i32, i32
  }
  func.func @transform_5(%arg0: i32) -> (i32, i32) {
    %c0_i32 = arith.constant 0 : i32
    %c0_i32_0 = arith.constant 0 : i32
    %c0_i32_1 = arith.constant 0 : i32
    return %c0_i32, %c0_i32_0 : i32, i32
  }
  func.func @transform_6(%arg0: i32) -> (i32, i32) {
    %c0_i32 = arith.constant 0 : i32
    %c0_i32_0 = arith.constant 0 : i32
    %c0_i32_1 = arith.constant 0 : i32
    return %c0_i32, %c0_i32_0 : i32, i32
  }
  func.func @transform_7(%arg0: i32) -> (i32, i32) {
    %c0_i32 = arith.constant 0 : i32
    %c0_i32_0 = arith.constant 0 : i32
    return %c0_i32, %arg0 : i32, i32
  }
}

</mosaic_0001>

<bundles_post_ra>
// kernel: tpu_custom_call.1
= control target key start
LH: loop header
LB: loop body
LE: loop exit
PB: predicated region body
PF: predicated region fallthrough
CT: control target
= control target key end

     0   :  { %vm58_vm0 = vcmask 130048   ;;  %v2365_v9 = vmov 0   ;;  %s2613_s0 = inlined_call_operand.vmem [shape: f32[16,128], index: 0, kind: input, shape index: {}]   ;;  %s2614_s1 = inlined_call_operand.vmem [shape: f32[32,16], index: 1, kind: input, shape index: {}]   ;;  %s2615_s2 = inlined_call_operand.vmem [shape: f32[32,1], index: 2, kind: input, shape index: {}]   ;;  %s2616_s3 = inlined_call_operand.vmem [shape: f32[32,32], index: 3, kind: input, shape index: {}]   ;;  %s2617_s4 = inlined_call_operand.vmem [shape: f32[32,1], index: 4, kind: input, shape index: {}]   ;;  %s2618_s5 = inlined_call_operand.vmem [shape: f32[1,32], index: 5, kind: input, shape index: {}]   ;;  %s2619_s6 = inlined_call_operand.<no memory space> [shape: f32[1,1], index: 6, kind: input, shape index: {}]   ;;  %s2620_s7 = inlined_call_operand.hbm [shape: f32[1,128], index: 7, kind: output, shape index: {}]  }
   0x1   :  { %v28_v0 = vld [vmem:[%s2613_s0] sm:$0xff]  ;;  %v29_v1 = vld [vmem:[%s2613_s0 + $0x8] sm:$0xff]  ;;  %v32_v7 = vld [vmem:[%s2614_s1 + $0x10] sm:$0xff]  ;;  %2323 = vset.pattern.permute.xlu0 %v2365_v9  ;;  %2324 = vset.pattern.permute.xlu1 %v2365_v9 }
   0x2   :  { %v30_v2 = vld [vmem:[%s2614_s1] sm:$0xff]  ;;  %v72_v3 = vand.u32 4294901760, %v28_v0  ;;  %v75_v4 = vand.u32 4294901760, %v29_v1  ;;  %v31_v6 = vld [vmem:[%s2614_s1 + $0x8] sm:$0xff]  ;;  %v33_v8 = vld [vmem:[%s2614_s1 + $0x18] sm:$0xff]  ;;  %v66_v12 = vsel %vm58_vm0, %v32_v7, 0 }
   0x3   :  { %v60_v5 = vsel %vm58_vm0, %v30_v2, 0  ;;  %v63_v11 = vsel %vm58_vm0, %v31_v6, 0  ;;  %v69_v13 = vsel %vm58_vm0, %v33_v8, 0  ;;  %v34_v14 = vld [vmem:[%s2615_s2] sm:$0xff]  ;;  %v36_v15 = vld [vmem:[%s2615_s2 + $0x10] sm:$0xff]  ;;  %v2441_v21 = vand.u32 4294901760, %v66_v12 }
   0x4   :  { %v2428_v10 = vand.u32 4294901760, %v60_v5  ;;  %v2436_v16 = vpack.c.bf16 %v75_v4, %v72_v3  ;;  %v180_v17 = vsub.f32 %v28_v0, %v72_v3  ;;  %v187_v18 = vsub.f32 %v29_v1, %v75_v4  ;;  %40 = vperm.xlu0 %2323, %v34_v14   ;;  %50 = vperm.xlu1 %2324, %v36_v15   ;;  %v35_v23 = vld [vmem:[%s2615_s2 + $0x8] sm:$0xff]  ;;  %v37_v28 = vld [vmem:[%s2615_s2 + $0x18] sm:$0xff] }
   0x5   :  { %v2438_v19 = vand.u32 4294901760, %v63_v11  ;;  %v2443_v22 = vand.u32 4294901760, %v69_v13 }
   0x6   :  { %v139_v20 = vsub.f32 %v60_v5, %v2428_v10  ;;  %v2160_v24 = vpack.c.bf16 %v187_v18, %v180_v17  ;;  %2153 = vmatprep.subr.bf16.mxu1 %v2436_v16  ;;  %v181_v26 = vand.u32 4294901760, %v180_v17  ;;  %v188_v27 = vand.u32 4294901760, %v187_v18 }
   0x7   :  { %v149_v25 = vsub.f32 %v63_v11, %v2438_v19 }
   0x8   :  { %13 = vsyncpa [#allocation4], 0  ;;  %1966 = vmatprep.mubr.f32.mxu0 %v139_v20  ;;  %2155 = vmatpush3.bf16.msra.mxu1 %v2436_v16  ;;  %v159_v29 = vsub.f32 %v66_v12, %v2441_v21  ;;  %v140_v30 = vand.u32 4294901760, %v139_v20  ;;  %v169_v31 = vsub.f32 %v69_v13, %v2443_v22  ;;  %v182_v33 = vsub.f32 %v180_v17, %v181_v26  ;;  %v667_v38 = vld [vmem:[%s2617_s4] sm:$0xff]  ;;  %v668_v50 = vld [vmem:[%s2617_s4 + $0x8] sm:$0xff]  ;;  %s2369_s12 = smov [#allocation3]  }
   0x9   :  { %2161 = vmatprep.subr.bf16.mxu0 %v2160_v24  ;;  %v150_v32 = vand.u32 4294901760, %v149_v25  ;;  %v189_v34 = vsub.f32 %v187_v18, %v188_v27  ;;  %45 = vperm.xlu0 %2323, %v35_v23   ;;  %v2168_v40 = vpack.c.bf16 %v188_v27, %v181_v26  ;;  %v669_v51 = vld [vmem:[%s2617_s4 + $0x10] sm:$0xff]  ;;  %v670_v52 = vld [vmem:[%s2617_s4 + $0x18] sm:$0xff]  ;;  %v663_v53 = vld [vmem:[%s2616_s3] sm:$0xff]  ;;  %vm691_vm1 = vcmask 261120   ;;  %s1820_s0 = sshll.u32 %s2369_s12, 4  ;;  %s1821_s0 = int_to_ptr.vmem [resolvable:$true] %s1820_s0 }
   0xa   :  { %2163 = vmatpush3.bf16.msra.mxu0 %v2160_v24  ;;  %v141_v35 = vsub.f32 %v139_v20, %v140_v30  ;;  %v160_v36 = vand.u32 4294901760, %v159_v29  ;;  %v170_v37 = vand.u32 4294901760, %v169_v31  ;;  %55 = vperm.xlu1 %2324, %v37_v28   ;;  %v183_v41 = vand.u32 4294901760, %v182_v33  ;;  %v664_v6 = vld [vmem:[%s2616_s3 + $0x8] sm:$0xff]  ;;  %v665_v11 = vld [vmem:[%s2616_s3 + $0x10] sm:$0xff]  ;;  %s2341_s13 = scalar_lea.vmem %s1821_s0, 16  ;;  %p2346_p1 = scmp.lt.s32.totalorder %s1821_s0, %s1821_s0 }
   0xb   :  { %2165 = vmatprep.subr.bf16.mxu0 %v2436_v16  ;;  %v151_v39 = vsub.f32 %v149_v25, %v150_v32  ;;  %v190_v42 = vand.u32 4294901760, %v189_v34  ;;  %v693_v54 = vsel %vm691_vm1, %v663_v53, 0  ;;  %v696_v13 = vsel %vm691_vm1, %v664_v6, 0  ;;  %p2342_p0 = scmp.ne.s32.totalorder %s1821_s0, %s2341_s13  ;;  %s2345_s14 = scalar_lea.vmem %s1821_s0, 32 }
   0xc   :  { %v142_v43 = vand.u32 4294901760, %v141_v35  ;;  %v161_v44 = vsub.f32 %v159_v29, %v160_v36  ;;  %v171_v45 = vsub.f32 %v169_v31, %v170_v37  ;;  %v2488_v55 = vand.u32 4294901760, %v693_v54  ;;  %p2347_p2 = scmp.lt.s32.totalorder %s2345_s14, %s2341_s13 }
   0xd   :  { %1967 = vmatmul.mubr.f32.vlgmr.msra.gmra.mrb[0].mxu0 %v149_v25  ;;  %v152_v46 = vand.u32 4294901760, %v151_v39  ;;  %v2156_v47 = vpack.c.bf16 %v190_v42, %v183_v41  ;;  %673 = vperm.xlu0 %2323, %v667_v38   ;;  %v699_v18 = vsel %vm691_vm1, %v665_v11, 0  ;;  %vm2367_vm2 = vmmov 0  }
   0xe   :  { %2167 = vmatpush3.bf16.msra.mxu0 %v2436_v16  ;;  %1969 = vmatprep.mubr.f32.mxu0 %v159_v29  ;;  %v162_v48 = vand.u32 4294901760, %v161_v44  ;;  %v172_v49 = vand.u32 4294901760, %v171_v45  ;;  %v2491_v56 = vsub.f32 %v693_v54, %v2488_v55  ;;  %p2348_p3 = por %p2347_p2, %p2346_p1 }
   0xf   :  { %1946 = vmatprep.mubr.f32.mxu1 %v142_v43  ;;  %2169 = vmatprep.subr.bf16.mxu0 %v2168_v40 }
  0x10   :  { %1947 = vmatmul.mubr.f32.vlgmr.msra.gmra.mrb[0].mxu1 %v152_v46  ;;  %2157 = vmatprep.subr.bf16.mxu1 %v2156_v47  ;;  %v775_v57 = vand.u32 4294901760, %v2491_v56  ;;  %p2349_p4 = pnand %p2348_p3, %p2342_p0 }
  0x11   :  { %1970 = vmatmul.mubr.f32.gmra.mrb[2].mxu0 %v169_v31  ;;  %1949 = vmatprep.mubr.f32.mxu1 %v162_v48 }
  0x12   :  { %1976 = vmatprep.mubr.f32.mxu0 %v140_v30  ;;  %2159 = vmatpush3.bf16.msra.mxu1 %v2156_v47  ;;  %v776_v58 = vsub.f32 %v2491_v56, %v775_v57 }
  0x13   :  { %678 = vperm.xlu1 %2324, %v668_v50   ;;  %683 = vperm.xlu0 %2323, %v669_v51  }
  0x14   :  { %1950 = vmatmul.mubr.f32.gmra.mrb[2].mxu1 %v172_v49  ;;  %v777_v59 = vand.u32 4294901760, %v776_v58 }
  0x15   :  { %1977 = vmatmul.mubr.f32.vlgmr.msra.gmra.mrb[0].mxu0 %v150_v32  ;;  %1956 = vmatprep.mubr.f32.mxu1 %v2428_v10 }
  0x16   :  { %2171 = vmatpush3.bf16.msra.mxu0 %v2168_v40  ;;  %1979 = vmatprep.mubr.f32.mxu0 %v160_v36 }
  0x17   :  { %2173 = vmatprep.subr.bf16.mxu0 %v2436_v16  ;;  %688 = vperm.xlu1 %2324, %v670_v52  }
  0x18   :  { %1957 = vmatmul.mubr.f32.vlgmr.msra.gmra.mrb[0].mxu1 %v2438_v19 }
  0x19   :  { %1980 = vmatmul.mubr.f32.gmra.mrb[2].mxu0 %v170_v37  ;;  %1959 = vmatprep.mubr.f32.mxu1 %v2441_v21 }
  0x1a   :  { %1986 = vmatprep.mubr.f32.mxu0 %v2428_v10 }
  0x1c   :  { %1960 = vmatmul.mubr.f32.gmra.mrb[2].mxu1 %v2443_v22 }
  0x1d   :  { %1987 = vmatmul.mubr.f32.vlgmr.msra.gmra.mrb[0].mxu0 %v2438_v19  ;;  %2010 = vmatprep.mubr.f32.mxu1 %v777_v59 }
  0x1e   :  { %2175 = vmatpush3.bf16.msra.mxu0 %v2436_v16  ;;  %1989 = vmatprep.mubr.f32.mxu0 %v2441_v21 }
  0x21   :  { %1990 = vmatmul.mubr.f32.gmra.mrb[2].mxu0 %v2443_v22 }
  0x22   :  { %1996 = vmatprep.mubr.f32.mxu0 %v2428_v10 }
  0x25   :  { %1997 = vmatmul.mubr.f32.vlgmr.msra.gmra.mrb[0].mxu0 %v2438_v19  ;;  %v666_v19 = vld [vmem:[%s2616_s3 + $0x18] sm:$0xff] }
  0x26   :  { %1999 = vmatprep.mubr.f32.mxu0 %v2441_v21  ;;  %v2508_v21 = vand.u32 4294901760, %v696_v13  ;;  %v702_v23 = vsel %vm691_vm1, %v666_v19, 0  ;;  %v1322_v19 = vld [vmem:[%s2618_s5] sm:$0x1] }
  0x27   :  { %v2516_v25 = vand.u32 4294901760, %v702_v23 }
  0x28   :  { %v2514_v24 = vsub.f32 %v696_v13, %v2508_v21 }
  0x29   :  { %2000 = vmatmul.mubr.f32.gmra.mrb[2].mxu0 %v2443_v22  ;;  %v2510_v22 = vand.u32 4294901760, %v699_v18  ;;  %v2523_v32 = vsub.f32 %v702_v23, %v2516_v25 }
  0x2a   :  { %v785_v30 = vand.u32 4294901760, %v2514_v24 }
  0x2b   :  { %v2519_v26 = vsub.f32 %v699_v18, %v2510_v22  ;;  %v805_v44 = vand.u32 4294901760, %v2523_v32 }
  0x2c   :  { %v786_v40 = vsub.f32 %v2514_v24, %v785_v30 }
  0x2d   :  { %v795_v34 = vand.u32 4294901760, %v2519_v26 }
  0x2e   :  { %v787_v53 = vand.u32 4294901760, %v786_v40 }
  0x2f   :  { %v796_v47 = vsub.f32 %v2519_v26, %v795_v34 }
  0x83   :  { %v41_v63 = vpop.permute.xlu0 %40  ;;  %v51_v1 = vpop.permute.xlu1 %50 }
  0x88   :  { %v46_v2 = vpop.permute.xlu0 %45 }
  0x89   :  { %v56_v9 = vpop.permute.xlu1 %55 }
  0xeb   :  { %v1958_v60 = vpop.f32.mrb[0].mxu1 }
  0xec   :  { %v255_v61 = vpop.f32.mrb[1].mxu1  ;;  %v2260_v3 = vadd.f32 %v1958_v60, %v46_v2  ;;  %v806_v60 = vsub.f32 %v2523_v32, %v805_v44 }
  0xed   :  { %v2262_v4 = vadd.f32 %v255_v61, %v41_v63  ;;  %v797_v63 = vand.u32 4294901760, %v796_v47 }
  0xef   :  { %v1961_v62 = vpop.f32.mrb[2].mxu1 }
  0xf0   :  { %v267_v0 = vpop.f32.mrb[3].mxu1  ;;  %v2264_v12 = vadd.f32 %v1961_v62, %v56_v9 }
  0xf1   :  { %v2266_v14 = vadd.f32 %v267_v0, %v51_v1 }
  0xf8   :  { %v1998_v5 = vpop.f32.mrb[0].mxu0 }
  0xf9   :  { %v2261_v7 = vadd.f32 %v2260_v3, %v1998_v5  ;;  %v637_v8 = vpop.f32.mrb[1].mxu0  ;;  %v807_v5 = vand.u32 4294901760, %v806_v60 }
  0xfa   :  { %v2263_v10 = vadd.f32 %v2262_v4, %v637_v8  ;;  %v674_v8 = vpop.permute.xlu0 %673 }
  0xfb   :  { %2325 = vtanh.f32 %v2261_v7 }
  0xfc   :  { %2327 = vtanh.f32 %v2263_v10  ;;  %v2001_v15 = vpop.f32.mrb[2].mxu0 }
  0xfd   :  { %v2265_v16 = vadd.f32 %v2264_v12, %v2001_v15  ;;  %v649_v17 = vpop.f32.mrb[3].mxu0 }
  0xfe   :  { %v2267_v20 = vadd.f32 %v2266_v14, %v649_v17  ;;  %v684_v15 = vpop.permute.xlu0 %683 }
  0xff   :  { %2329 = vtanh.f32 %v2265_v16 }
 0x100   :  { %2331 = vtanh.f32 %v2267_v20  ;;  %v1326_v20 = vsel %vm691_vm1, %v1322_v19, 0 }
 0x105   :  { %v2326_v27 = vpop.eup %2325 }
 0x106   :  { %v2328_v28 = vpop.eup %2327  ;;  %v708_v29 = vand.u32 4294901760, %v2326_v27 }
 0x107   :  { %v705_v31 = vand.u32 4294901760, %v2328_v28 }
 0x108   :  { %v822_v33 = vsub.f32 %v2326_v27, %v708_v29 }
 0x109   :  { %v2330_v35 = vpop.eup %2329  ;;  %v2526_v36 = vpack.c.bf16 %v708_v29, %v705_v31  ;;  %v815_v37 = vsub.f32 %v2328_v28, %v705_v31 }
 0x10a   :  { %v2332_v38 = vpop.eup %2331  ;;  %v714_v39 = vand.u32 4294901760, %v2330_v35  ;;  %v823_v41 = vand.u32 4294901760, %v822_v33 }
 0x10b   :  { %v711_v42 = vand.u32 4294901760, %v2332_v38  ;;  %2177 = vmatprep.subr.bf16.mxu1 %v2526_v36  ;;  %v816_v43 = vand.u32 4294901760, %v815_v37  ;;  %v2192_v45 = vpack.c.bf16 %v822_v33, %v815_v37 }
 0x10c   :  { %2179 = vmatpush3.bf16.msra.mxu1 %v2526_v36  ;;  %v824_v46 = vsub.f32 %v822_v33, %v823_v41  ;;  %v836_v48 = vsub.f32 %v2330_v35, %v714_v39 }
 0x10d   :  { %v2180_v49 = vpack.c.bf16 %v714_v39, %v711_v42  ;;  %v817_v50 = vsub.f32 %v815_v37, %v816_v43  ;;  %v829_v51 = vsub.f32 %v2332_v38, %v711_v42  ;;  %v2208_v52 = vpack.c.bf16 %v823_v41, %v816_v43 }
 0x10e   :  { %v825_v54 = vand.u32 4294901760, %v824_v46  ;;  %v837_v58 = vand.u32 4294901760, %v836_v48 }
 0x10f   :  { %2181 = vmatprep.subr.bf16.mxu1 %v2180_v49  ;;  %v818_v59 = vand.u32 4294901760, %v817_v50  ;;  %v830_v61 = vand.u32 4294901760, %v829_v51  ;;  %v2196_v62 = vpack.c.bf16 %v836_v48, %v829_v51 }
 0x110   :  { %2183 = vmatpush3.bf16.msra.mxu1 %v2180_v49  ;;  %v838_v0 = vsub.f32 %v836_v48, %v837_v58 }
 0x111   :  { %v2184_v1 = vpack.c.bf16 %v825_v54, %v818_v59  ;;  %v831_v2 = vsub.f32 %v829_v51, %v830_v61  ;;  %v2212_v3 = vpack.c.bf16 %v837_v58, %v830_v61 }
 0x112   :  { %v839_v4 = vand.u32 4294901760, %v838_v0 }
 0x113   :  { %2011 = vmatmul.mubr.f32.vlgmr.msra.gmra.mrb[4].mxu1 %v787_v53  ;;  %2185 = vmatprep.subr.bf16.mxu1 %v2184_v1  ;;  %v832_v6 = vand.u32 4294901760, %v831_v2 }
 0x114   :  { %2187 = vmatpush3.bf16.msra.mxu1 %v2184_v1  ;;  %2013 = vmatprep.mubr.f32.mxu1 %v797_v63  ;;  %v1324_v63 = vstv %s2619_s6 }
 0x115   :  { %v2188_v7 = vpack.c.bf16 %v839_v4, %v832_v6 }
 0x117   :  { %2014 = vmatmul.mubr.f32.gmra.mrb[6].mxu1 %v807_v5  ;;  %2189 = vmatprep.subr.bf16.mxu1 %v2188_v7 }
 0x118   :  { %2191 = vmatpush3.bf16.msra.mxu1 %v2188_v7  ;;  %2024 = vmatprep.mubr.f32.mxu1 %v2488_v55 }
 0x119   :  { %2193 = vmatprep.subr.bf16.mxu1 %v2192_v45 }
 0x11b   :  { %2025 = vmatmul.mubr.f32.vlgmr.msra.gmra.mrb[4].mxu1 %v2508_v21 }
 0x11c   :  { %2195 = vmatpush3.bf16.msra.mxu1 %v2192_v45  ;;  %2027 = vmatprep.mubr.f32.mxu1 %v2510_v22 }
 0x11d   :  { %2197 = vmatprep.subr.bf16.mxu1 %v2196_v62 }
 0x11f   :  { %2028 = vmatmul.mubr.f32.gmra.mrb[6].mxu1 %v2516_v25 }
 0x120   :  { %2199 = vmatpush3.bf16.msra.mxu1 %v2196_v62  ;;  %2038 = vmatprep.mubr.f32.mxu1 %v2491_v56  ;;  %v2366_v56 = vmov 0.0|0.0  }
 0x121   :  { %2201 = vmatprep.subr.bf16.mxu1 %v2526_v36  ;;  %2230 = vmatprep.subr.bf16.mxu0 %v2366_v56 }
 0x123   :  { %2039 = vmatmul.mubr.f32.vlgmr.msra.gmra.mrb[4].mxu1 %v2514_v24 }
 0x124   :  { %2203 = vmatpush3.bf16.msra.mxu1 %v2526_v36  ;;  %2041 = vmatprep.mubr.f32.mxu1 %v2519_v26 }
 0x125   :  { %2205 = vmatprep.subr.bf16.mxu1 %v2180_v49 }
 0x127   :  { %2042 = vmatmul.mubr.f32.gmra.mrb[6].mxu1 %v2523_v32 }
 0x128   :  { %2207 = vmatpush3.bf16.msra.mxu1 %v2180_v49  ;;  %2052 = vmatprep.mubr.f32.mxu1 %v775_v57  ;;  %v2368_v57 = vmov 0.0  }
 0x129   :  { %2209 = vmatprep.subr.bf16.mxu1 %v2208_v52  ;;  %2105 = vmatprep.mubr.msk.f32.mxu0 %vm2367_vm2, %v2368_v57 }
 0x12b   :  { %2053 = vmatmul.mubr.f32.vlgmr.msra.gmra.mrb[4].mxu1 %v785_v30 }
 0x12c   :  { %2211 = vmatpush3.bf16.msra.mxu1 %v2208_v52  ;;  %2055 = vmatprep.mubr.f32.mxu1 %v795_v34 }
 0x12d   :  { %2213 = vmatprep.subr.bf16.mxu1 %v2212_v3 }
 0x12f   :  { %2056 = vmatmul.mubr.f32.gmra.mrb[6].mxu1 %v805_v44 }
 0x130   :  { %2215 = vmatpush3.bf16.msra.mxu1 %v2212_v3  ;;  %2066 = vmatprep.mubr.f32.mxu1 %v2488_v55 }
 0x131   :  { %2217 = vmatprep.subr.bf16.mxu1 %v2526_v36 }
 0x133   :  { %2067 = vmatmul.mubr.f32.vlgmr.msra.gmra.mrb[4].mxu1 %v2508_v21 }
 0x134   :  { %2219 = vmatpush3.bf16.msra.mxu1 %v2526_v36  ;;  %2069 = vmatprep.mubr.f32.mxu1 %v2510_v22 }
 0x135   :  { %2221 = vmatprep.subr.bf16.mxu1 %v2180_v49 }
 0x137   :  { %2070 = vmatmul.mubr.f32.gmra.mrb[6].mxu1 %v2516_v25 }
 0x138   :  { %2223 = vmatpush3.bf16.msra.mxu1 %v2180_v49  ;;  %2080 = vmatprep.mubr.f32.mxu1 %v2488_v55  ;;  %v679_v55 = vpop.permute.xlu1 %678 }
 0x139   :  { %2224 = vmatprep.subr.bf16.mxu1 %v2366_v56 }
 0x13b   :  { %2081 = vmatmul.mubr.f32.vlgmr.msra.gmra.mrb[4].mxu1 %v2508_v21  ;;  %v2574_v21 = vand.u32 4294901760, %v1326_v20 }
 0x13c   :  { %2083 = vmatprep.mubr.f32.mxu1 %v2510_v22  ;;  %v689_v13 = vpop.permute.xlu1 %688 }
 0x13f   :  { %2084 = vmatmul.mubr.f32.gmra.mrb[6].mxu1 %v2516_v25  ;;  %v1398_v25 = vsub.f32 %v1326_v20, %v2574_v21 }
 0x140   :  { %2094 = vmatprep.mubr.msk.f32.mxu1 %vm2367_vm2, %v2368_v57 }
 0x141   :  { %v1399_v28 = vand.u32 4294901760, %v1398_v25 }
 0x143   :  { %v1400_v35 = vsub.f32 %v1398_v25, %v1399_v28 }
 0x145   :  { %v1401_v47 = vand.u32 4294901760, %v1400_v35 }
 0x20e   :  { %v2082_v9 = vpop.f32.mrb[4].mxu1 }
 0x20f   :  { %v2268_v10 = vadd.f32 %v2082_v9, %v679_v55  ;;  %v1296_v11 = vpop.f32.mrb[5].mxu1 }
 0x210   :  { %v2269_v12 = vadd.f32 %v1296_v11, %v674_v8 }
 0x211   :  { %2333 = vtanh.f32 %v2268_v10 }
 0x212   :  { %2335 = vtanh.f32 %v2269_v12  ;;  %v2085_v14 = vpop.f32.mrb[6].mxu1 }
 0x213   :  { %v2270_v16 = vadd.f32 %v2085_v14, %v689_v13  ;;  %v1308_v17 = vpop.f32.mrb[7].mxu1 }
 0x214   :  { %v2271_v18 = vadd.f32 %v1308_v17, %v684_v15 }
 0x215   :  { %2337 = vtanh.f32 %v2270_v16 }
 0x216   :  { %2339 = vtanh.f32 %v2271_v18 }
 0x21b   :  { %v2334_v22 = vpop.eup %2333 }
 0x21c   :  { %v2336_v23 = vpop.eup %2335  ;;  %v1332_v24 = vand.u32 4294901760, %v2334_v22 }
 0x21d   :  { %v1329_v26 = vand.u32 4294901760, %v2336_v23 }
 0x21e   :  { %v1416_v27 = vsub.f32 %v2334_v22, %v1332_v24 }
 0x21f   :  { %v2338_v29 = vpop.eup %2337  ;;  %v2225_v30 = vpack.c.bf16 %v1332_v24, %v1329_v26  ;;  %v1409_v31 = vsub.f32 %v2336_v23, %v1329_v26 }
 0x220   :  { %v2340_v32 = vpop.eup %2339  ;;  %v1338_v33 = vand.u32 4294901760, %v2338_v29  ;;  %v1417_v34 = vand.u32 4294901760, %v1416_v27 }
 0x221   :  { %2226 = vmatpush3.bf16.msra.mxu1 %v2225_v30  ;;  %v1335_v36 = vand.u32 4294901760, %v2340_v32  ;;  %v1410_v37 = vand.u32 4294901760, %v1409_v31  ;;  %v2237_v38 = vpack.c.bf16 %v1416_v27, %v1409_v31 }
 0x222   :  { %2227 = vmatprep.subr.bf16.mxu1 %v2366_v56  ;;  %v1430_v39 = vsub.f32 %v2338_v29, %v1338_v33  ;;  %v1418_v40 = vsub.f32 %v1416_v27, %v1417_v34 }
 0x223   :  { %v2228_v41 = vpack.c.bf16 %v1338_v33, %v1335_v36  ;;  %v1423_v42 = vsub.f32 %v2340_v32, %v1335_v36  ;;  %v1411_v43 = vsub.f32 %v1409_v31, %v1410_v37  ;;  %v2249_v44 = vpack.c.bf16 %v1417_v34, %v1410_v37 }
 0x224   :  { %v1419_v45 = vand.u32 4294901760, %v1418_v40  ;;  %v1431_v46 = vand.u32 4294901760, %v1430_v39 }
 0x225   :  { %2229 = vmatpush3.bf16.msra.mxu1 %v2228_v41  ;;  %v1412_v48 = vand.u32 4294901760, %v1411_v43  ;;  %v1424_v49 = vand.u32 4294901760, %v1423_v42  ;;  %v2240_v50 = vpack.c.bf16 %v1430_v39, %v1423_v42 }
 0x226   :  { %v1432_v51 = vsub.f32 %v1430_v39, %v1431_v46 }
 0x227   :  { %v2231_v52 = vpack.c.bf16 %v1419_v45, %v1412_v48  ;;  %v1425_v53 = vsub.f32 %v1423_v42, %v1424_v49  ;;  %v2252_v54 = vpack.c.bf16 %v1431_v46, %v1424_v49 }
 0x228   :  { %v1433_v58 = vand.u32 4294901760, %v1432_v51  ;;  %2095 = vmatmul.mubr.f32.vlgmr.msra.gmra.mrb[8].mxu1 %v1401_v47 }
 0x229   :  { %2232 = vmatpush3.bf16.msra.mxu0 %v2231_v52  ;;  %v1426_v59 = vand.u32 4294901760, %v1425_v53 }
 0x22a   :  { %2233 = vmatprep.subr.bf16.mxu0 %v2366_v56 }
 0x22b   :  { %v2234_v60 = vpack.c.bf16 %v1433_v58, %v1426_v59 }
 0x22d   :  { %2235 = vmatpush3.bf16.msra.mxu0 %v2234_v60 }
 0x22e   :  { %2236 = vmatprep.subr.bf16.mxu0 %v2366_v56 }
 0x230   :  { %2106 = vmatmul.mubr.f32.vlgmr.msra.gmra.mrb[4].mxu0 %v2574_v21 }
 0x231   :  { %2238 = vmatpush3.bf16.msra.mxu0 %v2237_v38  ;;  %2116 = vmatprep.mubr.msk.f32.mxu0 %vm2367_vm2, %v2368_v57 }
 0x232   :  { %2239 = vmatprep.subr.bf16.mxu0 %v2366_v56 }
 0x235   :  { %2241 = vmatpush3.bf16.msra.mxu0 %v2240_v50 }
 0x236   :  { %2242 = vmatprep.subr.bf16.mxu0 %v2366_v56 }
 0x238   :  { %2117 = vmatmul.mubr.f32.vlgmr.msra.gmra.mrb[4].mxu0 %v1398_v25 }
 0x239   :  { %2244 = vmatpush3.bf16.msra.mxu0 %v2225_v30  ;;  %2127 = vmatprep.mubr.msk.f32.mxu0 %vm2367_vm2, %v2368_v57 }
 0x23a   :  { %2245 = vmatprep.subr.bf16.mxu0 %v2366_v56 }
 0x23d   :  { %2247 = vmatpush3.bf16.msra.mxu0 %v2228_v41 }
 0x23e   :  { %2248 = vmatprep.subr.bf16.mxu0 %v2366_v56 }
 0x240   :  { %2128 = vmatmul.mubr.f32.vlgmr.msra.gmra.mrb[4].mxu0 %v1399_v28 }
 0x241   :  { %2250 = vmatpush3.bf16.msra.mxu0 %v2249_v44  ;;  %2138 = vmatprep.mubr.msk.f32.mxu0 %vm2367_vm2, %v2368_v57 }
 0x242   :  { %2251 = vmatprep.subr.bf16.mxu0 %v2366_v56 }
 0x245   :  { %2253 = vmatpush3.bf16.msra.mxu0 %v2252_v54 }
 0x246   :  { %2254 = vmatprep.subr.bf16.mxu0 %v2366_v56 }
 0x248   :  { %2139 = vmatmul.mubr.f32.vlgmr.msra.gmra.mrb[4].mxu0 %v2574_v21 }
 0x249   :  { %2256 = vmatpush3.bf16.msra.mxu0 %v2225_v30  ;;  %2149 = vmatprep.mubr.msk.f32.mxu0 %vm2367_vm2, %v2368_v57 }
 0x24a   :  { %2257 = vmatprep.subr.bf16.mxu0 %v2366_v56 }
 0x24d   :  { %2259 = vmatpush3.bf16.msra.mxu0 %v2228_v41 }
 0x250   :  { %2150 = vmatmul.mubr.f32.vlgmr.msra.gmra.mrb[4].mxu0 %v2574_v21 }
 0x2fb   :  { %v1403_v61 = vpop.f32.mrb[8].mxu1 }
 0x2fc   :  { %v2096_v62 = vpop.f32.mrb[9].mxu1  ;;  %v1404_v0 = vadd.f32 %v1403_v61, %v1324_v63 }
 0x323   :  { %v1809_v1 = vpop.f32.mrb[4].mxu0 }
 0x324   :  { %v2273_v2 = vadd.f32 %v1809_v1, %v1404_v0  ;;  %v2151_v3 = vpop.f32.mrb[5].mxu0 }
 0x326   :  { %1813 = vst [vmem:[#allocation3] sm:$0x1] %v2273_v2 }
 0x327   :  { %2352 = shalt.err (!%p2349_p4)
}
 0x328   :  { %s2353_s6 = scalar_lea.hbm %s2620_s7, 16 }
 0x329   :  { %p2354_p5 = scmp.ne.s32.totalorder %s2620_s7, %s2353_s6  ;;  %p2357_p6 = scmp.lt.u32.totalorder %s2353_s6, %s2620_s7 }
 0x32b   :  { %p2359_p7 = pnand %p2357_p6, %p2354_p5 }
 0x32d   :  { %2362 = shalt.err (!%p2359_p7)
}
 0x32e   :  { %1823 = dma.vmem_to_hbm [thread:$0]  %s1821_s0, 16, %s2620_s7, [#allocation4]  }
 0x32f   :  { %2363 = dma.done.wait [#allocation4], 16  }
 0x330   :  { %2364 = vsyncadd [#allocation4], 4294967280 }
 0x331   :  { %1827 = vsyncpa [#allocation4], 1 }

</bundles_post_ra>
